<compile_context>
chip_gen: v7x
topology: tpu7x:2x2x1
jax: 0.10.0
libtpu: 0.0.40
codegen_flags: <defaults>
</compile_context>

<pallas_src>
import math
import jax
import jax.numpy as jnp
from jax.experimental import pallas as pl
from jax.experimental.pallas import tpu as pltpu


def make_positional_encoding(d_model: int, max_len: int = 30,
                             dtype=jnp.float32) -> jnp.ndarray:
    """Deterministic sin/cos table identical to the PyTorch __init__ buffer.
    (Also handles odd d_model by truncating the cos columns.)"""
    position = jnp.arange(max_len, dtype=jnp.float32)[:, None]            # (max_len, 1)
    div_term = jnp.exp(jnp.arange(0, d_model, 2, dtype=jnp.float32)
                       * (-math.log(10000.0) / d_model))                  # (ceil(d/2),)
    angles = position * div_term                                          # (max_len, ceil(d/2))
    pe = jnp.zeros((max_len, d_model), dtype=jnp.float32)
    pe = pe.at[:, 0::2].set(jnp.sin(angles))
    pe = pe.at[:, 1::2].set(jnp.cos(angles[:, : d_model // 2]))
    return pe[None].astype(dtype)                                         # (1, max_len, d_model)


def _pe_add_kernel(x_ref, pe_ref, o_ref):
    # Lane-dense elementwise add on the VPU; pe block is (1, tc) and broadcasts over rows.
    o_ref[...] = (x_ref[...].astype(jnp.float32)
                  + pe_ref[...].astype(jnp.float32)).astype(o_ref.dtype)


# Total double-buffered block footprint budget (x + out + pe). Conservative enough for
# v7x's 64 MiB physical VMEM; v5e/v6e simply take the same (already large) tiles.
_VMEM_FOOTPRINT_BUDGET = 24 * 1024 * 1024


def _pick_tiles(B: int, N: int, itemsize: int, budget: int = _VMEM_FOOTPRINT_BUDGET):
    """Pick (tb, tc) block dims for a (B, N) slab.

    Blocks divide (B, N) exactly and stay lane-dense: tc is either N (full extent) or a
    multiple-of-128 divisor of N; tb is either B or a multiple-of-8 divisor of B.
    """
    # Column tile: the full row if it fits, else the largest multiple-of-128 divisor of N
    # whose single-row double-buffered footprint fits the budget.
    per_col = 2 * (2 * itemsize + 4)          # x + out (x.dtype) + pe (f32), 2 pipeline buffers
    max_cols = max(128, budget // per_col)
    if N <= max_cols or N % 128 != 0:
        tc = N
    else:
        tc = 128
        hi = min(N, max_cols)
        for t in range(hi - hi % 128, 127, -128):
            if N % t == 0:
                tc = t
                break
    # Row tile: as many rows per step as the budget allows.
    per_row = 2 * 2 * tc * itemsize           # x + out blocks, double-buffered
    max_rows = max(1, (budget - 2 * tc * 4) // per_row)
    if B <= max_rows:
        tb = B
    else:
        tb = B                                # fallback: full-extent block is always legal
        hi = min(B, max_rows)
        for t in range(hi - hi % 8, 7, -8):
            if B % t == 0:
                tb = t
                break
    return tb, tc


def positional_encoding_forward(x: jnp.ndarray, pe: jnp.ndarray,
                                *, donate_x: bool = False) -> jnp.ndarray:
    """x: (B, S, D); pe: (1, max_len, D) with max_len >= S. Returns x + pe[:, :S]."""
    B, S, D = x.shape
    N = S * D

    # Collapse (S, D) into one lane-dense trailing axis. The PE table only broadcasts
    # over the batch axis, so flattening the trailing axes preserves semantics exactly.
    x2 = x.reshape(B, N)
    pe2 = pe[:, :S, :].astype(jnp.float32).reshape(1, N)   # add in f32, cast at the store

    itemsize = jnp.dtype(x.dtype).itemsize
    tb, tc = _pick_tiles(B, N, itemsize)
    grid = (B // tb, N // tc)                 # demo shape -> (1, 1): one big block

    grid_spec = pltpu.PrefetchScalarGridSpec(
        num_scalar_prefetch=0,
        grid=grid,
        in_specs=[
            pl.BlockSpec((tb, tc), lambda i, j: (i, j)),   # x tile
            pl.BlockSpec((1, tc), lambda i, j: (0, j)),    # pe: resident across batch tiles
        ],
        out_specs=pl.BlockSpec((tb, tc), lambda i, j: (i, j)),
    )

    out2 = pl.pallas_call(
        _pe_add_kernel,
        out_shape=jax.ShapeDtypeStruct((B, N), x.dtype),
        grid_spec=grid_spec,
        input_output_aliases={0: 0} if donate_x else {},
        compiler_params=pltpu.CompilerParams(
            dimension_semantics=("parallel", "parallel"),  # v7x: shard steps over both TCs
            vmem_limit_bytes=64 * 1024 * 1024,             # raise v5e/v6e scoped default
        ),
    )(x2, pe2)
    return out2.reshape(B, S, D)


if __name__ == "__main__":
    # Small shapes consistent with the module's forward: (batch=2, seq=8, d_model=32)
    B, S, D = 2, 8, 32
    MAX_LEN = 30

    key = jax.random.PRNGKey(0)
    x = jax.random.normal(key, (B, S, D), dtype=jnp.float32)
    pe = make_positional_encoding(D, MAX_LEN, dtype=jnp.float32)

    out = positional_encoding_forward(x, pe)
    out = jax.block_until_ready(out)

    # sanity check against plain-JAX reference
    ref = x + pe[:, :S, :]
    assert out.shape == (B, S, D)
    assert jnp.allclose(out, ref, atol=1e-6, rtol=1e-6)

    print("KERNEL_OK")
</pallas_src>

<mosaic_0001>
module attributes {stable_mosaic.version = 11 : i64} {
  func.func @_pe_add_kernel(%arg0: i32, %arg1: i32, %arg2: memref<2x256xf32, #tpu.memory_space<vmem>>, %arg3: memref<1x256xf32, #tpu.memory_space<vmem>>, %arg4: memref<2x256xf32, #tpu.memory_space<vmem>>) attributes {dimension_semantics = [#tpu.dimension_semantics<parallel>, #tpu.dimension_semantics<parallel>], iteration_bounds = array<i64: 1, 1>, scalar_prefetch = 0 : i64, scratch_operands = 0 : i64, tpu.core_type = #tpu.core_type<tc>, window_params = [{transform_indices = @transform_0, window_bounds = array<i64: 2, 256>}, {transform_indices = @transform_1, window_bounds = array<i64: 1, 256>}, {transform_indices = @transform_2, window_bounds = array<i64: 2, 256>}]} {
    %c0 = arith.constant 0 : index
    %c0_0 = arith.constant 0 : index
    %0 = vector.load %arg2[%c0, %c0_0] : memref<2x256xf32, #tpu.memory_space<vmem>>, vector<2x256xf32>
    %c0_1 = arith.constant 0 : index
    %c0_2 = arith.constant 0 : index
    %1 = vector.load %arg3[%c0_1, %c0_2] : memref<1x256xf32, #tpu.memory_space<vmem>>, vector<1x256xf32>
    %2 = vector.broadcast %1 : vector<1x256xf32> to vector<2x256xf32>
    %3 = arith.addf %0, %2 : vector<2x256xf32>
    %c0_3 = arith.constant 0 : index
    %c0_4 = arith.constant 0 : index
    %4 = vector.load %arg4[%c0_3, %c0_4] : memref<2x256xf32, #tpu.memory_space<vmem>>, vector<2x256xf32>
    tpu.vector_store %arg4[%c0_3, %c0_4], %3 {strides = array<i32>} : memref<2x256xf32, #tpu.memory_space<vmem>>, vector<2x256xf32>,
    return
  }
  func.func @transform_0(%arg0: i32, %arg1: i32) -> (i32, i32) {
    %c0_i32 = arith.constant 0 : i32
    return %arg0, %arg1 : i32, i32
  }
  func.func @transform_1(%arg0: i32, %arg1: i32) -> (i32, i32) {
    %c0_i32 = arith.constant 0 : i32
    %c0_i32_0 = arith.constant 0 : i32
    return %c0_i32, %arg1 : i32, i32
  }
  func.func @transform_2(%arg0: i32, %arg1: i32) -> (i32, i32) {
    %c0_i32 = arith.constant 0 : i32
    return %arg0, %arg1 : i32, i32
  }
}

</mosaic_0001>

<bundles_post_ra>
// kernel: tpu_custom_call.1
= control target key start
LH: loop header
LB: loop body
LE: loop exit
PB: predicated region body
PF: predicated region fallthrough
CT: control target
= control target key end

     0   :  { %7 = vsyncpa [#allocation3], 0  ;;  %s205_s0 = inlined_call_operand.hbm [shape: f32[2,256], index: 0, kind: input, shape index: {}]   ;;  %s206_s1 = inlined_call_operand.hbm [shape: f32[1,256], index: 1, kind: input, shape index: {}]   ;;  %s207_s2 = inlined_call_operand.hbm [shape: f32[2,256], index: 2, kind: output, shape index: {}]  }
   0x1   :  { %8 = vsyncpa [#allocation6], 0 }
   0x2   :  { %9 = vsyncpa [#allocation4], 0  ;;  %s150_s9 = smov [#allocation2]   ;;  %s151_s11 = smov [#allocation5]  }
   0x3   :  { %s16_s10 = sshll.u32 %s150_s9, 4  ;;  %s26_s12 = sshll.u32 %s151_s11, 4  ;;  %s17_s10 = int_to_ptr.vmem [resolvable:$true] %s16_s10  ;;  %s27_s12 = int_to_ptr.vmem [resolvable:$true] %s26_s12 }
   0x4   :  { %s78_s15 = scalar_lea.hbm %s205_s0, 64 }
   0x5   :  { %p79_p0 = scmp.ne.s32.totalorder %s205_s0, %s78_s15  ;;  %p82_p1 = scmp.lt.u32.totalorder %s78_s15, %s205_s0 }
   0x7   :  { %p84_p2 = pnand %p82_p1, %p79_p0 }
   0x9   :  { %87 = shalt.err (!%p84_p2)
}
   0xa   :  { %s88_s20 = scalar_lea.vmem %s17_s10, 64  ;;  %p93_p4 = scmp.lt.s32.totalorder %s17_s10, %s17_s10 }
   0xb   :  { %p89_p3 = scmp.ne.s32.totalorder %s17_s10, %s88_s20  ;;  %p94_p5 = scmp.lt.s32.totalorder %s88_s20, %s88_s20 }
   0xd   :  { %p95_p6 = por %p94_p5, %p93_p4 }
   0xf   :  { %p96_p7 = pnand %p95_p6, %p89_p3 }
  0x11   :  { %99 = shalt.err (!%p96_p7)
}
  0x12   :  { %19 = dma.hbm_to_vmem [thread:$0]  %s205_s0, 64, %s17_s10, [#allocation3]  }
  0x13   :  { %s100_s25 = scalar_lea.hbm %s206_s1, 32 }
  0x14   :  { %p101_p8 = scmp.ne.s32.totalorder %s206_s1, %s100_s25  ;;  %p104_p9 = scmp.lt.u32.totalorder %s100_s25, %s206_s1 }
  0x16   :  { %p106_p10 = pnand %p104_p9, %p101_p8 }
  0x18   :  { %109 = shalt.err (!%p106_p10)
}
  0x19   :  { %s110_s30 = scalar_lea.vmem %s27_s12, 32  ;;  %p115_p12 = scmp.lt.s32.totalorder %s27_s12, %s27_s12 }
  0x1a   :  { %p111_p11 = scmp.ne.s32.totalorder %s27_s12, %s110_s30  ;;  %p116_p13 = scmp.lt.s32.totalorder %s110_s30, %s110_s30 }
  0x1c   :  { %p117_p0 = por %p116_p13, %p115_p12 }
  0x1e   :  { %p118_p1 = pnand %p117_p0, %p111_p11 }
  0x20   :  { %121 = shalt.err (!%p118_p1)
}
  0x21   :  { %29 = dma.hbm_to_vmem [thread:$0]  %s206_s1, 32, %s27_s12, [#allocation6]  }
  0x22   :  { %144 = dma.done.wait [#allocation3], 64  }
  0x23   :  { %145 = vsyncadd [#allocation3], 4294967232 }
  0x24   :  { %146 = dma.done.wait [#allocation6], 32  }
  0x25   :  { %147 = vsyncadd [#allocation6], 4294967264  ;;  %v39_v0 = vlaneseq  ;;  %v152_v1 = vmov 1983009808   ;;  %v37_v7 = vld [vmem:[#allocation5] sm:$0x3] }
  0x26   :  { %v49_v2 = vunpack.c.l.s4 %v152_v1  ;;  %v36_v12 = vld [vmem:[#allocation2] sm:$0xf]  ;;  %s153_s4 = smov [#allocation7]  }
  0x27   :  { %v40_v3 = vshrl.u32 %v39_v0, 7  ;;  %s64_s5 = sshll.u32 %s153_s4, 4  ;;  %s65_s5 = int_to_ptr.vmem [resolvable:$true] %s64_s5 }
  0x28   :  { %v50_v6 = vunpack.c.0.s8 %v49_v2  ;;  %s122_s1 = scalar_lea.vmem %s65_s5, 64  ;;  %p127_p3 = scmp.lt.s32.totalorder %s65_s5, %s65_s5 }
  0x29   :  { %v41_v4 = vsub.s32 0, %v40_v3  ;;  %v45_v5 = vsub.s32 1, %v40_v3  ;;  %p123_p2 = scmp.ne.s32.totalorder %s65_s5, %s122_s1  ;;  %p128_p4 = scmp.lt.s32.totalorder %s122_s1, %s122_s1 }
  0x2a   :  { %v53_v10 = vsub.s32 %v50_v6, %v40_v3 }
  0x2b   :  { %v42_v8 = vrot.slane %v37_v7, %v41_v4  ;;  %v46_v9 = vrot.slane %v37_v7, %v45_v5  ;;  %p129_p5 = por %p128_p4, %p127_p3 }
  0x2d   :  { %v47_v11 = vcombine.low %v42_v8, %v46_v9  ;;  %p130_p6 = pnand %p129_p5, %p123_p2 }
  0x2f   :  { %v54_v13 = vrot.slane %v47_v11, %v53_v10 }
  0x31   :  { %v56_v14 = vadd.f32 %v54_v13, %v36_v12 }
  0x33   :  { %57 = vst [vmem:[#allocation7] sm:$0xf] %v56_v14 }
  0x34   :  { %133 = shalt.err (!%p130_p6)
}
  0x35   :  { %s134_s8 = scalar_lea.hbm %s207_s2, 64 }
  0x36   :  { %p135_p7 = scmp.ne.s32.totalorder %s207_s2, %s134_s8  ;;  %p138_p8 = scmp.lt.u32.totalorder %s134_s8, %s207_s2 }
  0x38   :  { %p140_p9 = pnand %p138_p8, %p135_p7 }
  0x3a   :  { %143 = shalt.err (!%p140_p9)
}
  0x3b   :  { %67 = dma.vmem_to_hbm [thread:$0]  %s65_s5, 64, %s207_s2, [#allocation4]  }
  0x3c   :  { %148 = dma.done.wait [#allocation4], 64  }
  0x3d   :  { %149 = vsyncadd [#allocation4], 4294967232 }
  0x3e   :  { %71 = vsyncpa [#allocation3], 1 }
  0x3f   :  { %72 = vsyncpa [#allocation6], 1 }
  0x40   :  { %73 = vsyncpa [#allocation4], 1 }

</bundles_post_ra>
